<compile_context>
chip_gen: v7x
topology: tpu7x:2x2x1
jax: 0.10.0
libtpu: 0.0.40
codegen_flags: <defaults>
</compile_context>

<pallas_src>
import functools
import numpy as np
import jax
import jax.numpy as jnp
from jax import lax
from jax.experimental import pallas as pl
from jax.experimental.pallas import tpu as pltpu

NEG_INF = float("-inf")
INT_MAX = int(np.iinfo(np.int32).max)


def _default_num_chunks():
    """2 chunks on dual-TensorCore chips (v4/v5p/v7x), 1 on single-TC v5e/v6e."""
    try:
        kind = jax.devices()[0].device_kind.lower()
    except Exception:
        return 2
    single_tc = any(t in kind for t in
                    ("v5e", "v5 lite", "v5lite", "v6e", "v6 lite", "v6lite", "trillium"))
    return 1 if single_tc else 2


def _cap_tile_v(H, tile_v):
    """Keep the double-buffered bf16 weight tile <= ~32 MiB (v7x VMEM is 64 MiB/TC)."""
    max_tile = max(128, ((32 * 1024 * 1024) // (4 * H)) // 128 * 128)
    return min(tile_v, max_tile)


def prepare_lm_head(lm_head_weight, *, tile_v=2048, num_chunks=None):
    """One-time weight layout: zero-pad vocab up to a multiple of tile_v*num_chunks
    and re-lay the weight as a contiguous (num_tiles, H, tile_v) bf16 slab so every
    grid step's DMA is a single contiguous run."""
    H, V = lm_head_weight.shape
    if num_chunks is None:
        num_chunks = _default_num_chunks()
    tile_v = _cap_tile_v(H, int(tile_v))
    group = tile_v * num_chunks
    v_pad = (-(-V // group)) * group
    w = lm_head_weight.astype(jnp.bfloat16)
    if v_pad != V:
        w = jnp.pad(w, ((0, 0), (0, v_pad - V)))
    num_tiles = v_pad // tile_v
    w_tiles = w.reshape(H, num_tiles, tile_v).transpose(1, 0, 2)   # (num_tiles, H, tile_v)
    return w_tiles, V, num_chunks


def _lm_argmax_kernel(x_ref, w_ref, max_out_ref, idx_out_ref, vmax_ref, vidx_ref, *,
                      vocab, tile_v, tiles_per_chunk, seq):
    """One grid step: logits tile = x @ W_tile (bf16 MXU, f32 acc), folded into an
    elementwise running (max, flattened-index) accumulator; per-chunk cross-lane
    reduction happens only on the last tile of the chunk."""
    c = pl.program_id(0)            # vocab chunk       (parallel)
    j = pl.program_id(1)            # tile within chunk (arbitrary / streaming)

    # --- init accumulators for this chunk -------------------------------------
    @pl.when(j == 0)
    def _():
        vmax_ref[...] = jnp.full(vmax_ref.shape, NEG_INF, jnp.float32)
        vidx_ref[...] = jnp.full(vidx_ref.shape, INT_MAX, jnp.int32)

    # --- logits tile: bf16 operands, f32 accumulation on the MXU --------------
    logits = jnp.dot(x_ref[...], w_ref[...],
                     preferred_element_type=jnp.float32)          # (S, tile_v) f32

    v_off = (c * tiles_per_chunk + j) * tile_v
    col = lax.broadcasted_iota(jnp.int32, (seq, tile_v), 1)
    vcol = col + v_off
    # mask zero-padded vocab columns so they can never win the argmax
    logits = jnp.where(vcol < vocab, logits, NEG_INF)

    if seq == 1:
        flat_idx = vcol                                           # row term is 0
    else:
        row = lax.broadcasted_iota(jnp.int32, (seq, tile_v), 0)
        flat_idx = row * vocab + vcol                             # torch row-major flatten

    # --- elementwise running (max, index); strict '>' keeps the earliest tile ---
    better = logits > vmax_ref[...]
    vidx_ref[...] = jnp.where(better, flat_idx, vidx_ref[...])
    vmax_ref[...] = jnp.where(better, logits, vmax_ref[...])

    # --- once per chunk: cross-lane reduce and emit the chunk partial ----------
    @pl.when(j == tiles_per_chunk - 1)
    def _():
        vmax = vmax_ref[...]
        m = jnp.max(jnp.max(vmax, axis=1, keepdims=True), axis=0, keepdims=True)   # (1,1)
        cand = jnp.where(vmax == m, vidx_ref[...], jnp.int32(INT_MAX))
        idx = jnp.min(jnp.min(cand, axis=1, keepdims=True), axis=0, keepdims=True)  # (1,1)
        max_out_ref[...] = jnp.broadcast_to(m.reshape(1, 1, 1), max_out_ref.shape)
        idx_out_ref[...] = jnp.broadcast_to(idx.reshape(1, 1, 1), idx_out_ref.shape)


@functools.partial(jax.jit, static_argnames=("vocab", "num_chunks"))
def lm_head_argmax(hidden_states, w_tiles, *, vocab, num_chunks):
    """Fused lm_head + flattened argmax.
    hidden_states: [..., H];  w_tiles: (num_tiles, H, tile_v) bf16 from prepare_lm_head.
    Returns the flattened argmax index (== token id for S == 1), int32."""
    num_tiles, H, tile_v = w_tiles.shape
    assert num_tiles % num_chunks == 0
    tiles_per_chunk = num_tiles // num_chunks
    vocab_padded = num_tiles * tile_v

    x = hidden_states.reshape(-1, H).astype(jnp.bfloat16)   # cast once, not per step
    S = x.shape[0]
    if S * vocab >= 2 ** 31:                                 # int32 flat-index guard
        raise ValueError("S * vocab exceeds int32 flat-index range")

    kernel = functools.partial(_lm_argmax_kernel, vocab=vocab, tile_v=tile_v,
                               tiles_per_chunk=tiles_per_chunk, seq=S)

    # VMEM budget: 2x weight tile (double buffer) + 2x activations + accumulators.
    w_tile_bytes = H * tile_v * 2
    needed = 2 * w_tile_bytes + 2 * S * H * 2 + S * tile_v * 8 + (4 << 20)
    vmem_limit = int(min(56 * 1024 * 1024, max(32 * 1024 * 1024, needed)))

    cost = pl.CostEstimate(
        flops=2 * S * H * vocab_padded,
        transcendentals=0,
        bytes_accessed=H * vocab_padded * 2 + S * H * 2 + num_chunks * 128 * 8,
    )

    pmax, pidx = pl.pallas_call(
        kernel,
        grid=(num_chunks, tiles_per_chunk),
        in_specs=[
            # activations: resident for the whole grid
            pl.BlockSpec((S, H), lambda c, j: (0, 0)),
            # weight: one contiguous (H, tile_v) bf16 tile streamed per step
            pl.BlockSpec((None, H, tile_v),
                         lambda c, j: (c * tiles_per_chunk + j, 0, 0)),
        ],
        out_specs=[
            pl.BlockSpec((1, 1, 128), lambda c, j: (c, 0, 0)),
            pl.BlockSpec((1, 1, 128), lambda c, j: (c, 0, 0)),
        ],
        out_shape=(jax.ShapeDtypeStruct((num_chunks, 1, 128), jnp.float32),
                   jax.ShapeDtypeStruct((num_chunks, 1, 128), jnp.int32)),
        scratch_shapes=[pltpu.VMEM((S, tile_v), jnp.float32),
                        pltpu.VMEM((S, tile_v), jnp.int32)],
        compiler_params=pltpu.CompilerParams(
            dimension_semantics=("parallel", "arbitrary"),
            vmem_limit_bytes=vmem_limit),
        cost_estimate=cost,
    )(x, w_tiles)

    # tiny cross-chunk combine (num_chunks elements); min index breaks ties
    pmax = pmax[:, 0, 0]
    pidx = pidx[:, 0, 0]
    gmax = jnp.max(pmax)
    token = jnp.min(jnp.where(pmax == gmax, pidx, jnp.int32(INT_MAX)))
    return token.astype(jnp.int32)


def reference_lm(hidden_states, lm_head_weight):
    """Pure-JAX reference mirroring torch: argmax over flattened lm_head logits."""
    H, _ = lm_head_weight.shape
    x = hidden_states.reshape(-1, H).astype(jnp.bfloat16)
    logits = jnp.dot(x, lm_head_weight.astype(jnp.bfloat16),
                     preferred_element_type=jnp.float32)
    return jnp.argmax(logits)                      # flattened, first occurrence on ties


if __name__ == "__main__":
    key = jax.random.PRNGKey(0)
    H, V = 256, 1000          # small stand-in for hidden=2048, vocab=151936 (V NOT a tile multiple)
    k_w, k_x1, k_x2 = jax.random.split(key, 3)

    # bf16 lm_head weight (bias-free, Qwen convention)
    lm_w = (0.02 * jax.random.normal(k_w, (H, V), jnp.float32)).astype(jnp.bfloat16)

    cases = []
    for S, kx in ((1, k_x1), (3, k_x2)):           # decode (S=1) and a small prefill (S=3)
        hs = jax.random.normal(kx, (1, S, H), jnp.float32)
        cases.append((S, hs, int(reference_lm(hs, lm_w))))

    # exercise multi-tile streaming, the padded-tile/chunk path, and both chunk counts
    for tile_v, num_chunks in ((256, 1), (256, 2), (512, None)):
        w_tiles, vocab, nc = prepare_lm_head(lm_w, tile_v=tile_v, num_chunks=num_chunks)
        for S, hs, ref in cases:
            tok = lm_head_argmax(hs, w_tiles, vocab=vocab, num_chunks=nc)
            tok = int(jax.block_until_ready(tok))
            assert tok == ref, (tile_v, nc, S, tok, ref)

    print("KERNEL_OK")
</pallas_src>

<mosaic_0001>
module attributes {stable_mosaic.version = 11 : i64} {
  func.func @_lm_argmax_kernel(%arg0: i32, %arg1: i32, %arg2: memref<1x256xbf16, #tpu.memory_space<vmem>>, %arg3: memref<1x256x256xbf16, #tpu.memory_space<vmem>>, %arg4: memref<1x1x128xf32, #tpu.memory_space<vmem>>, %arg5: memref<1x1x128xi32, #tpu.memory_space<vmem>>, %arg6: memref<1x256xf32, #tpu.memory_space<vmem>>, %arg7: memref<1x256xi32, #tpu.memory_space<vmem>>) attributes {dimension_semantics = [#tpu.dimension_semantics<parallel>, #tpu.dimension_semantics<arbitrary>], iteration_bounds = array<i64: 1, 4>, scalar_prefetch = 0 : i64, scratch_operands = 2 : i64, tpu.core_type = #tpu.core_type<tc>, window_params = [{pipeline_mode = #tpu.pipeline_mode<synchronous>, transform_indices = @transform_0, window_bounds = array<i64: 1, 256>}, {transform_indices = @transform_1, window_bounds = array<i64: 1, 256, 256>}, {transform_indices = @transform_2, window_bounds = array<i64: 1, 1, 128>}, {transform_indices = @transform_3, window_bounds = array<i64: 1, 1, 128>}]} {
    %c0_i32 = arith.constant 0 : i32
    %0 = arith.cmpi eq, %arg1, %c0_i32 : i32
    %1 = arith.extui %0 : i1 to i32
    %c0_i32_0 = arith.constant 0 : i32
    %2 = arith.cmpi ne, %1, %c0_i32_0 : i32
    scf.if %2 {
      %cst_17 = arith.constant 0xFF800000 : f32
      %28 = vector.broadcast %cst_17 : f32 to vector<1x256xf32>
      %c0_18 = arith.constant 0 : index
      %c0_19 = arith.constant 0 : index
      %29 = vector.load %arg6[%c0_18, %c0_19] : memref<1x256xf32, #tpu.memory_space<vmem>>, vector<1x256xf32>
      tpu.vector_store %arg6[%c0_18, %c0_19], %28 {strides = array<i32>} : memref<1x256xf32, #tpu.memory_space<vmem>>, vector<1x256xf32>,
      %c2147483647_i32 = arith.constant 2147483647 : i32
      %30 = vector.broadcast %c2147483647_i32 : i32 to vector<1x256xi32>
      %c0_20 = arith.constant 0 : index
      %c0_21 = arith.constant 0 : index
      %31 = vector.load %arg7[%c0_20, %c0_21] : memref<1x256xi32, #tpu.memory_space<vmem>>, vector<1x256xi32>
      tpu.vector_store %arg7[%c0_20, %c0_21], %30 {strides = array<i32>} : memref<1x256xi32, #tpu.memory_space<vmem>>, vector<1x256xi32>,
    } else {
    }
    %c0 = arith.constant 0 : index
    %c0_1 = arith.constant 0 : index
    %3 = vector.load %arg2[%c0, %c0_1] : memref<1x256xbf16, #tpu.memory_space<vmem>>, vector<1x256xbf16>
    %c0_2 = arith.constant 0 : index
    %c0_3 = arith.constant 0 : index
    %c0_4 = arith.constant 0 : index
    %4 = vector.load %arg3[%c0_2, %c0_3, %c0_4] : memref<1x256x256xbf16, #tpu.memory_space<vmem>>, vector<1x256x256xbf16>
    %5 = vector.shape_cast %4 : vector<1x256x256xbf16> to vector<256x256xbf16>
    %cst = arith.constant dense<0.000000e+00> : vector<1x256xf32>
    %6 = tpu.matmul %3, %5, %cst {dimension_numbers = #tpu.dot_dimension_numbers<[1], [0], [0], [1], [0, 0, 1, 1], [], []>} : vector<1x256xbf16>, vector<256x256xbf16>, vector<1x256xf32> -> vector<1x256xf32>
    %c4_i32 = arith.constant 4 : i32
    %7 = arith.muli %arg0, %c4_i32 : i32
    %8 = arith.addi %7, %arg1 : i32
    %c256_i32 = arith.constant 256 : i32
    %9 = arith.muli %8, %c256_i32 : i32
    %10 = tpu.iota {dimensions = array<i32: 1>} : vector<1x256xi32>
    %11 = vector.broadcast %9 : i32 to vector<1x256xi32>
    %12 = arith.addi %10, %11 : vector<1x256xi32>
    %c1000_i32 = arith.constant 1000 : i32
    %13 = vector.broadcast %c1000_i32 : i32 to vector<1x256xi32>
    %14 = arith.cmpi slt, %12, %13 : vector<1x256xi32>
    %cst_5 = arith.constant 0xFF800000 : f32
    %15 = vector.broadcast %cst_5 : f32 to vector<1x256xf32>
    %16 = arith.select %14, %6, %15 : vector<1x256xi1>, vector<1x256xf32>
    %c0_6 = arith.constant 0 : index
    %c0_7 = arith.constant 0 : index
    %17 = vector.load %arg6[%c0_6, %c0_7] : memref<1x256xf32, #tpu.memory_space<vmem>>, vector<1x256xf32>
    %18 = arith.cmpf ogt, %16, %17 : vector<1x256xf32>
    %c0_8 = arith.constant 0 : index
    %c0_9 = arith.constant 0 : index
    %19 = vector.load %arg7[%c0_8, %c0_9] : memref<1x256xi32, #tpu.memory_space<vmem>>, vector<1x256xi32>
    %20 = arith.select %18, %12, %19 : vector<1x256xi1>, vector<1x256xi32>
    %c0_10 = arith.constant 0 : index
    %c0_11 = arith.constant 0 : index
    %21 = vector.load %arg7[%c0_10, %c0_11] : memref<1x256xi32, #tpu.memory_space<vmem>>, vector<1x256xi32>
    tpu.vector_store %arg7[%c0_10, %c0_11], %20 {strides = array<i32>} : memref<1x256xi32, #tpu.memory_space<vmem>>, vector<1x256xi32>,
    %c0_12 = arith.constant 0 : index
    %c0_13 = arith.constant 0 : index
    %22 = vector.load %arg6[%c0_12, %c0_13] : memref<1x256xf32, #tpu.memory_space<vmem>>, vector<1x256xf32>
    %23 = arith.select %18, %16, %22 : vector<1x256xi1>, vector<1x256xf32>
    %c0_14 = arith.constant 0 : index
    %c0_15 = arith.constant 0 : index
    %24 = vector.load %arg6[%c0_14, %c0_15] : memref<1x256xf32, #tpu.memory_space<vmem>>, vector<1x256xf32>
    tpu.vector_store %arg6[%c0_14, %c0_15], %23 {strides = array<i32>} : memref<1x256xf32, #tpu.memory_space<vmem>>, vector<1x256xf32>,
    %c3_i32 = arith.constant 3 : i32
    %25 = arith.cmpi eq, %arg1, %c3_i32 : i32
    %26 = arith.extui %25 : i1 to i32
    %c0_i32_16 = arith.constant 0 : i32
    %27 = arith.cmpi ne, %26, %c0_i32_16 : i32
    scf.if %27 {
      %c0_17 = arith.constant 0 : index
      %c0_18 = arith.constant 0 : index
      %28 = vector.load %arg6[%c0_17, %c0_18] : memref<1x256xf32, #tpu.memory_space<vmem>>, vector<1x256xf32>
      %cst_19 = arith.constant dense<0xFF800000> : vector<1xf32>
      %29 = vector.multi_reduction <maximumf>, %28, %cst_19 [1] : vector<1x256xf32> to vector<1xf32>
      %30 = vector.shape_cast %29 : vector<1xf32> to vector<1x1xf32>
      %cst_20 = arith.constant dense<0xFF800000> : vector<1xf32>
      %31 = vector.multi_reduction <maximumf>, %30, %cst_20 [0] : vector<1x1xf32> to vector<1xf32>
      %32 = vector.shape_cast %31 : vector<1xf32> to vector<1x1xf32>
      %33 = vector.broadcast %32 : vector<1x1xf32> to vector<1x256xf32>
      %34 = arith.cmpf oeq, %28, %33 : vector<1x256xf32>
      %c0_21 = arith.constant 0 : index
      %c0_22 = arith.constant 0 : index
      %35 = vector.load %arg7[%c0_21, %c0_22] : memref<1x256xi32, #tpu.memory_space<vmem>>, vector<1x256xi32>
      %c2147483647_i32 = arith.constant 2147483647 : i32
      %36 = vector.broadcast %c2147483647_i32 : i32 to vector<1x256xi32>
      %37 = arith.select %34, %35, %36 : vector<1x256xi1>, vector<1x256xi32>
      %cst_23 = arith.constant dense<2147483647> : vector<1xi32>
      %38 = vector.multi_reduction <minsi>, %37, %cst_23 [1] : vector<1x256xi32> to vector<1xi32>
      %39 = vector.shape_cast %38 : vector<1xi32> to vector<1x1xi32>
      %cst_24 = arith.constant dense<2147483647> : vector<1xi32>
      %40 = vector.multi_reduction <minsi>, %39, %cst_24 [0] : vector<1x1xi32> to vector<1xi32>
      %41 = vector.shape_cast %40 : vector<1xi32> to vector<1x1xi32>
      %42 = vector.shape_cast %32 : vector<1x1xf32> to vector<1x1x1xf32>
      %43 = vector.shape_cast %42 : vector<1x1x1xf32> to vector<1x1x1xf32>
      %44 = vector.broadcast %43 : vector<1x1x1xf32> to vector<1x1x128xf32>
      %c0_25 = arith.constant 0 : index
      %c0_26 = arith.constant 0 : index
      %c0_27 = arith.constant 0 : index
      %45 = vector.load %arg4[%c0_25, %c0_26, %c0_27] : memref<1x1x128xf32, #tpu.memory_space<vmem>>, vector<1x1x128xf32>
      tpu.vector_store %arg4[%c0_25, %c0_26, %c0_27], %44 {strides = array<i32>} : memref<1x1x128xf32, #tpu.memory_space<vmem>>, vector<1x1x128xf32>,
      %46 = vector.shape_cast %41 : vector<1x1xi32> to vector<1x1x1xi32>
      %47 = vector.shape_cast %46 : vector<1x1x1xi32> to vector<1x1x1xi32>
      %48 = vector.broadcast %47 : vector<1x1x1xi32> to vector<1x1x128xi32>
      %c0_28 = arith.constant 0 : index
      %c0_29 = arith.constant 0 : index
      %c0_30 = arith.constant 0 : index
      %49 = vector.load %arg5[%c0_28, %c0_29, %c0_30] : memref<1x1x128xi32, #tpu.memory_space<vmem>>, vector<1x1x128xi32>
      tpu.vector_store %arg5[%c0_28, %c0_29, %c0_30], %48 {strides = array<i32>} : memref<1x1x128xi32, #tpu.memory_space<vmem>>, vector<1x1x128xi32>,
    } else {
    }
    return
  }
  func.func @transform_0(%arg0: i32, %arg1: i32) -> (i32, i32) {
    %c0_i32 = arith.constant 0 : i32
    %c0_i32_0 = arith.constant 0 : i32
    %c0_i32_1 = arith.constant 0 : i32
    return %c0_i32, %c0_i32_0 : i32, i32
  }
  func.func @transform_1(%arg0: i32, %arg1: i32) -> (i32, i32, i32) {
    %c4_i32 = arith.constant 4 : i32
    %0 = arith.muli %arg0, %c4_i32 : i32
    %1 = arith.addi %0, %arg1 : i32
    %c0_i32 = arith.constant 0 : i32
    %c0_i32_0 = arith.constant 0 : i32
    %c0_i32_1 = arith.constant 0 : i32
    return %1, %c0_i32, %c0_i32_0 : i32, i32, i32
  }
  func.func @transform_2(%arg0: i32, %arg1: i32) -> (i32, i32, i32) {
    %c0_i32 = arith.constant 0 : i32
    %c0_i32_0 = arith.constant 0 : i32
    %c0_i32_1 = arith.constant 0 : i32
    return %arg0, %c0_i32, %c0_i32_0 : i32, i32, i32
  }
  func.func @transform_3(%arg0: i32, %arg1: i32) -> (i32, i32, i32) {
    %c0_i32 = arith.constant 0 : i32
    %c0_i32_0 = arith.constant 0 : i32
    %c0_i32_1 = arith.constant 0 : i32
    return %arg0, %c0_i32, %c0_i32_0 : i32, i32, i32
  }
}

</mosaic_0001>

<bundles_post_ra>
// kernel: lm_head_argmax.1
= control target key start
LH: loop header
LB: loop body
LE: loop exit
PB: predicated region body
PF: predicated region fallthrough
CT: control target
= control target key end

     0   :  { %9 = vsyncpa [#allocation5], 0  ;;  %s1168_s0 = inlined_call_operand.vmem [shape: bf16[1,256], index: 0, kind: input, shape index: {}]   ;;  %s1169_s1 = inlined_call_operand.hbm [shape: bf16[4,256,256], index: 1, kind: input, shape index: {}]   ;;  %s1170_s2 = inlined_call_operand.vmem [shape: f32[1,1,128], index: 2, kind: output, shape index: {0}]   ;;  %s1171_s3 = inlined_call_operand.vmem [shape: s32[1,1,128], index: 3, kind: output, shape index: {1}]  }
   0x1   :  { %11 = vsyncpa [#allocation5 + $0x1], 0  ;;  %s988_s12 = smov 0   ;;  %s990_s13 = smov 0  }
   0x2   :  { %s992_s14 = smov 0   ;;  %s994_s15 = smov 0  }
   0x3   :  { %s996_s16 = smov 0   ;;  %s998_s17 = smov 0  }
   0x4 LB: > { %s723_s18 = sadd.s32 4294967295, %s960_s17   ;;  %s26_s19 = sadd.s32 1, %s956_s16  ;;  %s960_s17 = sphi %s998_s17, %s17_s17   ;;  %s956_s16 = sphi %s996_s16, %s1179_s16   ;;  %s952_s15 = sphi %s994_s15, %s1178_s15   ;;  %s948_s14 = sphi %s992_s14, %s1177_s14   ;;  %s944_s13 = sphi %s990_s13, %s1176_s13   ;;  %s940_s12 = sphi %s988_s12, %s1175_s12  }
   0x5   : > { %p27_p0 = scmp.ge.s32.totalorder %s26_s19, 4  ;;  %s61_s20 = sadd.s32 1, %s948_s14 }
   0x6   : > { %p68_p1 = scmp.ne.s32.totalorder %s948_s14, %s944_s13  ;;  %p69_p2 = scmp.eq.s32.totalorder %s960_s17, 0 }
   0x7   : > { %s1181_s19 = smov (%p27_p0, %s26_s19), 0  ;;  %p74_p4 = scmp.ne.s32.totalorder %s944_s13, %s940_s12 }
   0x8   : > { %p1024_p3 = por %p69_p2, %p68_p1  ;;  %s58_s22 = ssub.s32 %s956_s16, %s1181_s19 }
   0x9   : > { %p75_p5 = scmp.eq.s32.totalorder %s723_s18, 0  ;;  %p59_p6 = scmp.eq.s32.totalorder %s58_s22, 0 }
   0xa   : > { %p778_p8 = scmp.lt.s32.totalorder %s960_s17, 4  ;;  %s153_s25 = sand.u32 1, %s948_s14  }
   0xb   : > { %p1031_p7 = por %p75_p5, %p74_p4  ;;  %s771_s26 = sshll.u32 %s956_s16, 12 }
   0xc   : > { %s1037_s24 = scalar_select %p59_p6, %s948_s14, %s61_s20  }
   0xd   : > { %s726_s27 = sshll.u32 %s153_s25, 8  ;;  %s1044_s30 = scalar_lea.hbm %s1169_s1, %s771_s26 }
   0xe   : > { %s157_s4 = scalar_lea.vmem [#allocation4], %s726_s27  ;;  %p1048_p9 = pnand %p778_p8, %p1024_p3 }
   0xf   : > { %s166_s5 = sshll.u32 %s157_s4, 4  ;;  %s1054_s7 = scalar_lea.sflag [#allocation5], %s153_s25  ;;  %s1052_s5 = int_to_ptr.vmem [resolvable:$true] %s166_s5 }
  0x10   : > { %s880_s8 = scalar_lea.hbm %s1044_s30, 4096  ;;  %p882_p11 = pneg %p1048_p9 }
  0x11   : > { %p881_p10 = scmp.ne.s32.totalorder %s1044_s30, %s880_s8  ;;  %s885_s11 = scalar_lea.hbm %s1169_s1, 16384 }
  0x12   : > { %p886_p0 = scmp.lt.u32.totalorder %s1044_s30, %s1169_s1  ;;  %p887_p1 = scmp.lt.u32.totalorder %s885_s11, %s880_s8 }
  0x13   : > { %p883_p12 = pnand %p882_p11, %p881_p10  ;;  %p889_p3 = scmp.lt.u32.totalorder %s880_s8, %s1044_s30 }
  0x14   : > { %p888_p2 = por %p887_p1, %p886_p0 }
  0x15   : > { %p884_p13 = pneg %p883_p12 }
  0x16   : > { %p890_p4 = por %p889_p3, %p888_p2 }
  0x18   : > { %p891_p5 = pnand %p890_p4, %p884_p13 }
  0x1a   : > { %894 = shalt.err (!%p891_p5)
}
  0x1b   : > { %s895_s20 = scalar_lea.vmem %s1052_s5, 4096  ;;  %s962_s21 = smov [#allocation4]  }
  0x1c   : > { %p896_p6 = scmp.ne.s32.totalorder %s1052_s5, %s895_s20  ;;  %s900_s22 = sshll.u32 %s962_s21, 4  ;;  %s901_s22 = int_to_ptr.vmem [resolvable:$false] %s900_s22 }
  0x1d   : > { %s902_s25 = scalar_lea.vmem %s901_s22, 8192  ;;  %p903_p12 = scmp.lt.s32.totalorder %s1052_s5, %s901_s22 }
  0x1e   : > { %p898_p8 = pnand %p896_p6, %p882_p11  ;;  %p904_p0 = scmp.lt.s32.totalorder %s902_s25, %s895_s20 }
  0x20   : > { %p899_p10 = pneg %p898_p8  ;;  %p905_p1 = por %p904_p0, %p903_p12 }
  0x22   : > { %p906_p2 = pnand %p905_p1, %p899_p10 }
  0x24   : > { %909 = shalt.err (!%p906_p2)
}
  0x25   : > { %s963_s26 = smov 128   ;;  %s964_s27 = smov 8  }
  0x26   : > { %777 = dma.hbm_to_vmem [thread:$0]  (!%p1048_p9), %s1044_s30, 4096, %s1052_s5, %s1054_s7, %s963_s26, %s963_s26, %s964_s27  }
  0x27   : > { %p729_p11 = scmp.ge.s32.totalorder %s960_s17, 1  ;;  %p174_p13 = scmp.lt.s32.totalorder %s960_s17, 5 }
  0x29   : > { %p175_p3 = pnand %p729_p11, %p174_p13 }
  0x2a   : > { %s180_s28 = sand.u32 (!%p175_p3), 1, %s944_s13  }
  0x2b   : > { %178 = sbr.rel (%p175_p3) target bundleno = 806 (0x326), region = 28  ;;  %s730_s29 = sshll.u32 (!%p175_p3), %s180_s28, 8 }
  0x2c   : > { %s181_s4 = scalar_lea.sflag (!%p175_p3), [#allocation5], %s180_s28  ;;  %s1085_s8 = scalar_lea.vmem (!%p175_p3), [#allocation4], %s730_s29 }
  0x32   : > { %935 = dma.done.wait (%p1031_p7), %s181_s4, 4096  }
  0x33   : > { %937 = vsyncadd (%p1031_p7), %s181_s4, 4294963200  ;;  %p731_p4 = scmp.ne.s32.totalorder %s952_s15, 0 }
  0x34   : > { %v220_v0 = vlaneseq (!%p731_p4)  ;;  %v965_v1 = vmov (!%p731_p4), -inf   ;;  %v966_v2 = vmov (!%p731_p4), 2147483647  }
  0x35   : > { %219 = sbr.rel (%p731_p4) target bundleno = 60 (0x3c), region = 36 }
  0x36   : > { %vm222_vm0 = vcmp.lt.s32.totalorder (!%p731_p4), %v220_v0, 256 }
  0x37   : > { %224 = vst.msk [vmem:[#allocation2] sm:$0x3] (!%p731_p4), %vm222_vm0, %v965_v1  ;;  %225 = vst.msk [vmem:[#allocation3] sm:$0x3] (!%p731_p4), %vm222_vm0, %v966_v2 }
  0x3c PF: > { %v832_v3 = vld [vmem:[%s1085_s8 + $0x4] ss:$8 sps:$4 sm:$0xff]   ;;  %v834_v4 = vld [vmem:[%s1085_s8] ss:$8 sps:$4 sm:$0xff]   ;;  %v835_v5 = vld [vmem:[%s1085_s8 + $0x14] ss:$8 sps:$4 sm:$0xff]   ;;  %v271_v14 = vlaneseq }
  0x3d   : > { %444 = vmatprep.subr.bf16.mxu0 %v832_v3  ;;  %v837_v6 = vld [vmem:[%s1085_s8 + $0x10] ss:$8 sps:$4 sm:$0xff]   ;;  %v838_v7 = vld [vmem:[%s1085_s8 + $0x24] ss:$8 sps:$4 sm:$0xff]   ;;  %v840_v8 = vld [vmem:[%s1085_s8 + $0x20] ss:$8 sps:$4 sm:$0xff]  }
  0x3e   : > { %445 = vmatpush1.bf16.msra.mxu0 %v834_v4  ;;  %v841_v9 = vld [vmem:[%s1085_s8 + $0x34] ss:$8 sps:$4 sm:$0xff]   ;;  %v843_v10 = vld [vmem:[%s1085_s8 + $0x30] ss:$8 sps:$4 sm:$0xff]   ;;  %v844_v11 = vld [vmem:[%s1085_s8 + $0x44] ss:$8 sps:$4 sm:$0xff]  }
  0x3f   : > { %446 = vmatprep.subr.bf16.mxu0 %v835_v5  ;;  %v967_v12 = vmov 1966171168   ;;  %v846_v15 = vld [vmem:[%s1085_s8 + $0x40] ss:$8 sps:$4 sm:$0xff]   ;;  %v847_v16 = vld [vmem:[%s1085_s8 + $0x54] ss:$8 sps:$4 sm:$0xff]  }
  0x40   : > { %v269_v13 = vunpack.c.l.s4 %v967_v12  ;;  %v272_v18 = vshrl.u32 %v271_v14, 7  ;;  %v849_v19 = vld [vmem:[%s1085_s8 + $0x50] ss:$8 sps:$4 sm:$0xff]   ;;  %v850_v20 = vld [vmem:[%s1085_s8 + $0x64] ss:$8 sps:$4 sm:$0xff]   ;;  %v489_v45 = vand.u32 127, %v271_v14 }
  0x41   : > { %v732_v22 = vld.sshfl [vmem:[%s1168_s0] sm:$0x11 pattern:$0x75316420]  ;;  %v852_v24 = vld [vmem:[%s1085_s8 + $0x60] ss:$8 sps:$4 sm:$0xff]  }
  0x42   : > { %447 = vmatpush1.bf16.msra.mxu0 %v837_v6  ;;  %v270_v17 = vunpack.c.0.s8 %v269_v13  ;;  %v267_v23 = vcombine.high %v732_v22, %v732_v22  ;;  %v853_v25 = vld [vmem:[%s1085_s8 + $0x74] ss:$8 sps:$4 sm:$0xff]   ;;  %v855_v27 = vld [vmem:[%s1085_s8 + $0x70] ss:$8 sps:$4 sm:$0xff]   ;;  %v856_v28 = vld [vmem:[%s1085_s8 + $0x84] ss:$8 sps:$4 sm:$0xff]  }
  0x43   : > { %448 = vmatprep.subr.bf16.mxu0 %v838_v7  ;;  %v858_v29 = vld [vmem:[%s1085_s8 + $0x80] ss:$8 sps:$4 sm:$0xff]   ;;  %v859_v30 = vld [vmem:[%s1085_s8 + $0x94] ss:$8 sps:$4 sm:$0xff]   ;;  %v861_v31 = vld [vmem:[%s1085_s8 + $0x90] ss:$8 sps:$4 sm:$0xff]  }
  0x44   : > { %v1106_v21 = vsub.s32 %v270_v17, %v272_v18  ;;  %v862_v32 = vld [vmem:[%s1085_s8 + $0xa4] ss:$8 sps:$4 sm:$0xff]   ;;  %v864_v33 = vld [vmem:[%s1085_s8 + $0xa0] ss:$8 sps:$4 sm:$0xff]   ;;  %v865_v34 = vld [vmem:[%s1085_s8 + $0xb4] ss:$8 sps:$4 sm:$0xff]  }
  0x45   : > { %v867_v35 = vld [vmem:[%s1085_s8 + $0xb0] ss:$8 sps:$4 sm:$0xff]   ;;  %v868_v36 = vld [vmem:[%s1085_s8 + $0xc4] ss:$8 sps:$4 sm:$0xff]   ;;  %v870_v37 = vld [vmem:[%s1085_s8 + $0xc0] ss:$8 sps:$4 sm:$0xff]  }
  0x46   : > { %449 = vmatpush1.bf16.msra.mxu0 %v840_v8  ;;  %v281_v26 = vrot.slane %v267_v23, %v1106_v21  ;;  %v871_v38 = vld [vmem:[%s1085_s8 + $0xd4] ss:$8 sps:$4 sm:$0xff]   ;;  %v873_v39 = vld [vmem:[%s1085_s8 + $0xd0] ss:$8 sps:$4 sm:$0xff]   ;;  %v874_v40 = vld [vmem:[%s1085_s8 + $0xe4] ss:$8 sps:$4 sm:$0xff]   ;;  %v274_v44 = vrot.slane %v732_v22, %v1106_v21 }
  0x47   : > { %450 = vmatprep.subr.bf16.mxu0 %v841_v9  ;;  %v876_v41 = vld [vmem:[%s1085_s8 + $0xe0] ss:$8 sps:$4 sm:$0xff]   ;;  %v877_v42 = vld [vmem:[%s1085_s8 + $0xf4] ss:$8 sps:$4 sm:$0xff]   ;;  %v879_v43 = vld [vmem:[%s1085_s8 + $0xf0] ss:$8 sps:$4 sm:$0xff]  }
  0x48   : > { %476 = vmatprep.mubr.bf16.mxu0 %v281_v26  ;;  %s765_s5 = sshll.u32 %s952_s15, 8  ;;  %v490_v47 = vadd.s32 128, %v489_v45  ;;  %v502_v49 = vsub.s32 0, %v272_v18  ;;  %v498_v50 = vld [vmem:[#allocation2] sm:$0x3]  ;;  %v506_v52 = vsub.s32 1, %v272_v18 }
  0x49   : > { %v491_v46 = vstv %s765_s5  ;;  %v512_v53 = vld [vmem:[#allocation3] sm:$0x3]  ;;  %v543_v54 = vld [vmem:[#allocation2] sm:$0x3]  ;;  %vm540_vm5 = vcmp.lt.s32.totalorder %v271_v14, 256  ;;  %p766_p7 = scmp.ne.s32.totalorder %s952_s15, 3 }
  0x4a   : > { %451 = vmatpush1.bf16.msra.mxu0 %v843_v10  ;;  %v492_v48 = vadd.s32 %v491_v46, %v489_v45  ;;  %v493_v51 = vadd.s32 %v491_v46, %v490_v47  ;;  %v503_v55 = vrot.slane %v498_v50, %v502_v49  ;;  %v516_v56 = vrot.slane %v512_v53, %v502_v49 }
  0x4b   : > { %452 = vmatprep.subr.bf16.mxu0 %v844_v11  ;;  %v548_v57 = vrot.slane %v543_v54, %v502_v49  ;;  %v507_v58 = vrot.slane %v498_v50, %v506_v52  ;;  %v520_v60 = vrot.slane %v512_v53, %v506_v52  ;;  %v552_v61 = vrot.slane %v543_v54, %v506_v52 }
  0x4c   : > { %vm494_vm1 = vcmp.lt.s32.totalorder %v492_v48, 1000  ;;  %vm495_vm2 = vcmp.lt.s32.totalorder %v493_v51, 1000  ;;  %vm592_vm6 = vcmask (!%p766_p7), 1040384  }
  0x4e   : > { %453 = vmatpush1.bf16.msra.mxu0 %v846_v15 }
  0x4f   : > { %454 = vmatprep.subr.bf16.mxu0 %v847_v16 }
  0x52   : > { %455 = vmatpush1.bf16.msra.mxu0 %v849_v19 }
  0x53   : > { %456 = vmatprep.subr.bf16.mxu0 %v850_v20 }
  0x56   : > { %457 = vmatpush1.bf16.msra.mxu0 %v852_v24 }
  0x57   : > { %458 = vmatprep.subr.bf16.mxu0 %v853_v25 }
  0x5a   : > { %459 = vmatpush1.bf16.msra.mxu0 %v855_v27 }
  0x5b   : > { %460 = vmatprep.subr.bf16.mxu0 %v856_v28 }
  0x5e   : > { %461 = vmatpush1.bf16.msra.mxu0 %v858_v29 }
  0x5f   : > { %462 = vmatprep.subr.bf16.mxu0 %v859_v30 }
  0x62   : > { %463 = vmatpush1.bf16.msra.mxu0 %v861_v31 }
  0x63   : > { %464 = vmatprep.subr.bf16.mxu0 %v862_v32 }
  0x66   : > { %465 = vmatpush1.bf16.msra.mxu0 %v864_v33 }
  0x67   : > { %466 = vmatprep.subr.bf16.mxu0 %v865_v34 }
  0x6a   : > { %467 = vmatpush1.bf16.msra.mxu0 %v867_v35 }
  0x6b   : > { %468 = vmatprep.subr.bf16.mxu0 %v868_v36 }
  0x6e   : > { %469 = vmatpush1.bf16.msra.mxu0 %v870_v37 }
  0x6f   : > { %470 = vmatprep.subr.bf16.mxu0 %v871_v38 }
  0x72   : > { %471 = vmatpush1.bf16.msra.mxu0 %v873_v39 }
  0x73   : > { %472 = vmatprep.subr.bf16.mxu0 %v874_v40 }
  0x76   : > { %473 = vmatpush1.bf16.msra.mxu0 %v876_v41 }
  0x77   : > { %474 = vmatprep.subr.bf16.mxu0 %v877_v42 }
  0x7a   : > { %475 = vmatpush1.bf16.msra.mxu0 %v879_v43 }
  0x7d   : > { %477 = vmatmul.mubr.bf16.vlgmr.msra.gmra.mrb[0].mxu0 %v274_v44 }
 0x150   : > { %v478_v59 = vpop.f32.mrb[0].mxu0 }
 0x151   : > { %v496_v62 = vsel %vm494_vm1, %v478_v59, -inf  ;;  %v480_v63 = vpop.f32.mrb[1].mxu0 }
 0x152   : > { %vm510_vm3 = vcmp.gt.f32.partialorder %v496_v62, %v503_v55  ;;  %v497_v0 = vsel %vm495_vm2, %v480_v63, -inf  ;;  %v482_v1 = vpop.f32.mrb[2].mxu0 }
 0x153   : > { %v521_v2 = vsel %vm510_vm3, %v492_v48, %v516_v56  ;;  %v555_v3 = vsel %vm510_vm3, %v496_v62, %v548_v57  ;;  %vm511_vm4 = vcmp.gt.f32.partialorder %v497_v0, %v507_v58  ;;  %v483_v4 = vpop.f32.mrb[3].mxu0 }
 0x154   : > { %v522_v5 = vsel %vm511_vm4, %v493_v51, %v520_v60  ;;  %v556_v6 = vsel %vm511_vm4, %v497_v0, %v552_v61 }
 0x155   : > { %v523_v7 = vcombine.low %v521_v2, %v522_v5  ;;  %v559_v8 = vcombine.low %v555_v3, %v556_v6  ;;  %579 = sbr.rel (%p766_p7) target bundleno = 806 (0x326), region = 40 }
 0x157   : > { %v530_v9 = vrot.slane %v523_v7, %v1106_v21  ;;  %v566_v10 = vrot.slane %v559_v8, %v1106_v21 }
 0x159   : > { %v537_v11 = vrot.slane %v530_v9, %v1106_v21  ;;  %v573_v12 = vrot.slane %v566_v10, %v1106_v21 }
 0x15b   : > { %542 = vst.msk [vmem:[#allocation3] sm:$0x3] %vm540_vm5, %v537_v11  ;;  %575 = vst.msk [vmem:[#allocation2] sm:$0x3] %vm540_vm5, %v573_v12 }
 0x162   : > { %v580_v13 = vld [vmem:[#allocation2] sm:$0x3]  ;;  %v605_v20 = vld [vmem:[#allocation3] sm:$0x3] }
 0x163   : > { %v585_v15 = vrot.slane %v580_v13, %v502_v49  ;;  %v589_v16 = vrot.slane %v580_v13, %v506_v52 }
 0x165   : > { %v593_v17 = vsel %vm592_vm6, %v585_v15, -inf  ;;  %v594_v18 = vsel %vm592_vm6, %v589_v16, -inf }
 0x166   : > { %v595_v19 = vmax.f32 %v593_v17, %v594_v18 }
 0x168   : > { %596 = vmax.xlane.f32.xlu0 %v595_v19 }
 0x1f5   : > { %v597_v14 = vpop.xlane.xlu0 %596 }
 0x1f6   : > { %v602_v22 = vrot.slane %v597_v14, %v502_v49  ;;  %633 = vst [vmem:[%s1170_s2] sm:$0x1] %v597_v14 }
 0x1f8   : > { %vm604_vm7 = vcmp.eq.f32.partialorder %v580_v13, %v602_v22 }
 0x1f9   : > { %v606_v21 = vsel %vm604_vm7, %v605_v20, 2147483647 }
 0x1fa   : > { %v610_v23 = vrot.slane %v606_v21, %v502_v49  ;;  %v614_v24 = vrot.slane %v606_v21, %v506_v52 }
 0x1fc   : > { %v615_v25 = vsel %vm592_vm6, %v610_v23, 2147483647  ;;  %v616_v26 = vsel %vm592_vm6, %v614_v24, 2147483647 }
 0x1fd   : > { %vm617_vm8 = vcmp.lt.s32.totalorder %v615_v25, %v616_v26 }
 0x1fe   : > { %v618_v27 = vsel %vm617_vm8, %v615_v25, %v616_v26 }
 0x1ff   : > { %v620_v28 = vshra.s32 %v618_v27, 16  ;;  %v619_v30 = vand.u32 65535, %v618_v27 }
 0x201   : > { %v622_v29 = vcvt.s32.f32 %v620_v28  ;;  %v621_v32 = vcvt.s32.f32 %v619_v30 }
 0x203   : > { %623 = vmin.xlane.f32.xlu0 %v622_v29 }
 0x290   : > { %v624_v31 = vpop.xlane.xlu0 %623 }
 0x291   : > { %vm625_vm9 = vcmp.eq.f32.partialorder %v622_v29, %v624_v31  ;;  %v630_v34 = vcvt.f32.s32 %v624_v31 }
 0x292   : > { %v626_v33 = vsel %vm625_vm9, %v621_v32, inf }
 0x293   : > { %627 = vmin.xlane.f32.xlu1 %v626_v33  ;;  %v631_v36 = vshll.u32 %v630_v34, 16 }
 0x320   : > { %v628_v35 = vpop.xlane.xlu1 %627 }
 0x321   : > { %v629_v37 = vcvt.f32.s32 %v628_v35 }
 0x323   : > { %v632_v38 = vadd.s32 %v631_v36, %v629_v37 }
 0x325   : > { %634 = vst [vmem:[%s1171_s3] sm:$0x1] %v632_v38 }
 0x326 PF: > { %s17_s17 = sadd.s32 1, %s960_s17   ;;  %s1175_s12 = smov %s944_s13 }
 0x327   : > { %p14_p9 = scmp.ge.s32.totalorder %s17_s17, 6   ;;  %s1176_s13 = smov %s948_s14 }
 0x328   : > { %s1177_s14 = smov %s1037_s24  ;;  %s1178_s15 = smov %s956_s16 }
 0x329   : > { %s1179_s16 = smov %s1181_s19  ;;  %16 = sbr.rel (!%p14_p9) target bundleno = 4 (0x4), region = 88 }
 0x330   :  { %664 = vsyncpa [#allocation5], 1 }
 0x331   :  { %666 = vsyncpa [#allocation5 + $0x1], 1 }

</bundles_post_ra>
